<compile_context>
chip_gen: v7x
topology: tpu7x:2x2x1
jax: 0.10.0
libtpu: 0.0.40
codegen_flags: <defaults>
</compile_context>

<pallas_src>
import functools
import numpy as np

import jax
import jax.numpy as jnp
from jax.experimental import pallas as pl
from jax.experimental.pallas import tpu as pltpu


def _round_up(v, m):
    return ((v + m - 1) // m) * m


def _vmem_limit_bytes():
    # Generation-aware VMEM budget: ~100 MiB on v5e/v6e (128 MiB physical),
    # ~48 MiB on v7x (64 MiB per-TC physical).  Falls back safely if the query
    # is unavailable.
    try:
        cap = int(pltpu.get_tpu_info().vmem_capacity_bytes)
    except Exception:
        cap = 64 * 1024 * 1024
    return int(min(max(cap - 16 * 1024 * 1024, 32 * 1024 * 1024), 100 * 1024 * 1024))


# ----------------------------------------------------------------------------
# Kernel 1: fused feature transform + packed attention logits (bf16 MXU)
# ----------------------------------------------------------------------------
def _prep_kernel(x_ref, w_ref, slab_ref):
    """slab = x @ [W | W@blockdiag(att_src,att_dst) | 0]; bf16 in, f32 acc, bf16 out."""
    slab_ref[...] = jnp.dot(x_ref[...], w_ref[...],
                            preferred_element_type=jnp.float32).astype(slab_ref.dtype)


# ----------------------------------------------------------------------------
# Kernel 2: row-tiled masked attention + fused GATLayer epilogue
# ----------------------------------------------------------------------------
def _attn_kernel(h_ref, asrcT_ref, adst_ref, bias_ref, hscale_ref, shift_ref, *rest,
                 heads, res_mode):
    if res_mode == 1:            # residual via Linear projection
        x_ref, wres_ref, out_ref = rest
    elif res_mode == 2:          # residual is identity (in_channels == heads*out)
        xres_ref, out_ref = rest
    else:                        # no residual
        (out_ref,) = rest
    tm, hd_pad = out_ref.shape

    adst = adst_ref[...]                                   # [TM, heads] f32
    acc = jnp.zeros((tm, hd_pad), jnp.float32)

    for h_i in range(heads):     # heads is small & static -> unrolled
        s = adst[:, h_i:h_i + 1] + asrcT_ref[h_i:h_i + 1, :]          # [TM, N]
        # LeakyReLU(0.2) as a single vmax; additive bf16 mask bias (0 / -1e30)
        # precomputed host-side, promoted per head (no cmp+select, no live f32 temp).
        e = jnp.maximum(s, 0.2 * s) + bias_ref[...]
        m = jnp.max(e, axis=1, keepdims=True)
        p = jnp.exp(e - m)                       # masked entries underflow to exactly 0
        denom = jnp.sum(p, axis=1, keepdims=True)          # >= 1 (self loop), f32
        # Full-width bf16 MXU dot against the entire h slab (no per-head lane slice /
        # repack; MXU push count depends on TM*K, not output width).  The per-head
        # column mask (with BN scale folded in) times the deferred EUP reciprocal
        # selects this head's d columns and zeroes packed-logit / padding columns.
        agg = jnp.dot(p.astype(jnp.bfloat16), h_ref[...],
                      preferred_element_type=jnp.float32)             # [TM, hd_pad]
        acc = acc + agg * (hscale_ref[h_i:h_i + 1, :]
                           * pl.reciprocal(denom, approx=True))

    out = acc + shift_ref[...]                 # folded GATConv bias + eval-mode BN
    if res_mode == 1:
        out = out + jnp.dot(x_ref[...], wres_ref[...],
                            preferred_element_type=jnp.float32)       # bf16 residual matmul
    elif res_mode == 2:
        out = out + xres_ref[...]              # identity residual (exact f32 add)
    out_ref[...] = jnp.maximum(out, 0.0)       # ReLU; lane-dense store (hd_pad % 128 == 0)


# ----------------------------------------------------------------------------
# Wrapper
# ----------------------------------------------------------------------------
def gat_layer_forward(params, x, edge_index, *, heads, out_channels,
                      residual=True, bn_eps=1e-5, tm=256):
    x = jnp.asarray(x, jnp.float32)
    n, f_in = x.shape
    d = out_channels
    hd = heads * d
    # Output width padded so there is room for the hd feature columns PLUS the
    # 2*heads packed logit columns, rounded to a lane-dense multiple of 128.
    hd_pad = _round_up(hd + 2 * heads, 128)

    tm = _round_up(max(int(tm), 16), 16)       # bf16 sublane packing
    n_pad = _round_up(n, tm)
    grid = (n_pad // tm,)

    # --- host-side glue ---------------------------------------------------------
    ei = np.asarray(edge_index)
    # Additive softmax mask bias: 0 on edges/self-loops, -1e30 elsewhere (bf16 stream).
    bias_np = np.full((n_pad, n_pad), -1e30, np.float32)
    bias_np[ei[1], ei[0]] = 0.0                          # message src (col) -> dst (row)
    bias_np[np.arange(n_pad), np.arange(n_pad)] = 0.0    # self loops (incl. padded rows)
    mask_bias = jnp.asarray(bias_np, jnp.bfloat16)

    # Augmented weight: cols [0,hd) = W, cols [hd, hd+2*heads) = W @ blockdiag(att)
    # so the attention logits come out of the SAME matmul as h.
    w_np = np.asarray(params["w"], np.float32)
    att_src_np = np.asarray(params["att_src"], np.float32)
    att_dst_np = np.asarray(params["att_dst"], np.float32)
    att_bd = np.zeros((hd, 2 * heads), np.float32)
    for h_i in range(heads):
        att_bd[h_i * d:(h_i + 1) * d, h_i] = att_src_np[h_i]
        att_bd[h_i * d:(h_i + 1) * d, heads + h_i] = att_dst_np[h_i]
    w_aug_np = np.zeros((f_in, hd_pad), np.float32)
    w_aug_np[:, :hd] = w_np
    w_aug_np[:, hd:hd + 2 * heads] = w_np @ att_bd
    w_aug = jnp.asarray(w_aug_np, jnp.bfloat16)

    x_pad = jnp.pad(x, ((0, n_pad - n), (0, 0)))
    x_bf16 = x_pad.astype(jnp.bfloat16)

    # Fold GATConv bias + eval-mode BatchNorm into scale/shift.
    inv_std = 1.0 / jnp.sqrt(params["bn_var"] + bn_eps)
    scale = params["bn_gamma"] * inv_std
    shift = params["bn_beta"] - params["bn_mean"] * scale + params["bias"] * scale

    w_res = None
    x_res = None
    if residual:
        if "w_res" in params:
            res_mode = 1
            shift = shift + params["b_res"]
            w_res = jnp.pad(jnp.asarray(params["w_res"], jnp.float32),
                            ((0, 0), (0, hd_pad - hd))).astype(jnp.bfloat16)
        else:
            res_mode = 2                                  # identity residual, exact add
            x_res = jnp.pad(x_pad, ((0, 0), (0, hd_pad - f_in)))
    else:
        res_mode = 0

    # Per-head column mask with the BN scale folded in (selects head h's d columns).
    scale_host = np.asarray(scale, np.float32)
    hscale_np = np.zeros((heads, hd_pad), np.float32)
    for h_i in range(heads):
        hscale_np[h_i, h_i * d:(h_i + 1) * d] = scale_host[h_i * d:(h_i + 1) * d]
    head_scale = jnp.asarray(hscale_np)
    shift_pad = jnp.pad(shift[None, :], ((0, 0), (0, hd_pad - hd)))

    cparams = pltpu.CompilerParams(dimension_semantics=("parallel",),
                                   vmem_limit_bytes=_vmem_limit_bytes())

    # --- kernel 1: h + packed attention logits in one bf16 matmul ---------------
    slab = pl.pallas_call(
        _prep_kernel,
        grid=grid,
        in_specs=[pl.BlockSpec((tm, f_in), lambda i: (i, 0)),
                  pl.BlockSpec((f_in, hd_pad), lambda i: (0, 0))],
        out_specs=pl.BlockSpec((tm, hd_pad), lambda i: (i, 0)),
        out_shape=jax.ShapeDtypeStruct((n_pad, hd_pad), jnp.bfloat16),
        compiler_params=cparams,
    )(x_bf16, w_aug)

    # Tiny layout plumbing outside the kernel (one transpose of a [N, heads] slice).
    alpha = slab[:, hd:hd + 2 * heads].astype(jnp.float32)
    asrcT = jnp.transpose(alpha[:, :heads])              # [heads, N]
    adst = alpha[:, heads:2 * heads]                     # [N, heads]

    # --- kernel 2: row-tiled attention + fused epilogue --------------------------
    in_specs = [
        pl.BlockSpec((n_pad, hd_pad), lambda i: (0, 0)),    # h slab (all sources), bf16
        pl.BlockSpec((heads, n_pad), lambda i: (0, 0)),     # alpha_src^T (all sources)
        pl.BlockSpec((tm, heads), lambda i: (i, 0)),        # alpha_dst (this row tile)
        pl.BlockSpec((tm, n_pad), lambda i: (i, 0)),        # additive mask bias tile (bf16)
        pl.BlockSpec((heads, hd_pad), lambda i: (0, 0)),    # per-head BN-scaled column mask
        pl.BlockSpec((1, hd_pad), lambda i: (0, 0)),        # folded shift
    ]
    args = [slab, asrcT, adst, mask_bias, head_scale, shift_pad]
    flops = 2 * heads * n_pad * n_pad * hd_pad
    if res_mode == 1:
        in_specs += [pl.BlockSpec((tm, f_in), lambda i: (i, 0)),      # x tile (residual)
                     pl.BlockSpec((f_in, hd_pad), lambda i: (0, 0))]  # residual weight
        args += [x_bf16, w_res]
        flops += 2 * n_pad * f_in * hd_pad
    elif res_mode == 2:
        in_specs += [pl.BlockSpec((tm, hd_pad), lambda i: (i, 0))]    # padded x (identity)
        args += [x_res]

    bytes_accessed = (n_pad * n_pad * 2                 # bf16 mask-bias stream
                      + n_pad * hd_pad * 2              # bf16 h slab
                      + n_pad * hd_pad * 4              # f32 output
                      + n_pad * (2 * f_in + 12 * heads))

    out_pad = pl.pallas_call(
        functools.partial(_attn_kernel, heads=heads, res_mode=res_mode),
        grid=grid,
        in_specs=in_specs,
        out_specs=pl.BlockSpec((tm, hd_pad), lambda i: (i, 0)),
        out_shape=jax.ShapeDtypeStruct((n_pad, hd_pad), jnp.float32),
        compiler_params=cparams,
        cost_estimate=pl.CostEstimate(flops=int(flops),
                                      transcendentals=int(heads * n_pad * n_pad),
                                      bytes_accessed=int(bytes_accessed)),
    )(*args)

    return out_pad[:n, :hd]


# ----------------------------------------------------------------------------
# Parameter init (mirrors GATConv / BatchNorm1d / Linear shapes)
# ----------------------------------------------------------------------------
def init_gat_layer_params(key, in_channels, out_channels, heads, residual=True):
    hd = heads * out_channels
    ks = jax.random.split(key, 10)

    def glorot(k, shape):
        lim = float(np.sqrt(6.0 / (shape[0] + shape[-1])))
        return jax.random.uniform(k, shape, jnp.float32, -lim, lim)

    params = {
        "w": glorot(ks[0], (in_channels, hd)),
        "att_src": glorot(ks[1], (heads, out_channels)),
        "att_dst": glorot(ks[2], (heads, out_channels)),
        "bias": 0.02 * jax.random.normal(ks[3], (hd,), jnp.float32),
        "bn_gamma": jax.random.uniform(ks[4], (hd,), jnp.float32, 0.5, 1.5),
        "bn_beta": 0.1 * jax.random.normal(ks[5], (hd,), jnp.float32),
        "bn_mean": 0.1 * jax.random.normal(ks[6], (hd,), jnp.float32),
        "bn_var": jax.random.uniform(ks[7], (hd,), jnp.float32, 0.5, 1.5),
    }
    if residual and in_channels != hd:
        params["w_res"] = glorot(ks[8], (in_channels, hd))
        params["b_res"] = 0.02 * jax.random.normal(ks[9], (hd,), jnp.float32)
    return params


# ----------------------------------------------------------------------------
# Pure-JAX dense reference (eval-mode GATLayer forward)
# ----------------------------------------------------------------------------
def _gat_layer_ref(params, x, adj, *, heads, out_channels, residual=True, bn_eps=1e-5):
    d = out_channels
    h = x @ params["w"]
    outs = []
    for h_i in range(heads):
        hh = h[:, h_i * d:(h_i + 1) * d]
        a_src = jnp.sum(hh * params["att_src"][h_i][None, :], axis=1)
        a_dst = jnp.sum(hh * params["att_dst"][h_i][None, :], axis=1)
        e = a_dst[:, None] + a_src[None, :]
        e = jnp.where(e > 0, e, 0.2 * e)
        e = jnp.where(adj > 0, e, -1e30)
        p = jnp.exp(e - e.max(axis=1, keepdims=True))
        p = jnp.where(adj > 0, p, 0.0)
        attn = p / p.sum(axis=1, keepdims=True)
        outs.append(attn @ hh)
    out = jnp.concatenate(outs, axis=1) + params["bias"][None, :]
    out = (out - params["bn_mean"]) / jnp.sqrt(params["bn_var"] + bn_eps)
    out = out * params["bn_gamma"] + params["bn_beta"]
    if residual:
        res = x @ params["w_res"] + params["b_res"] if "w_res" in params else x
        out = out + res
    return jnp.maximum(out, 0.0)


# ----------------------------------------------------------------------------
if __name__ == "__main__":
    in_channels, out_channels, heads = 16, 8, 4
    n = 40
    key = jax.random.PRNGKey(0)
    kx, kp = jax.random.split(key)
    x = jax.random.normal(kx, (n, in_channels), jnp.float32)

    # Small deterministic graph: bidirectional chain + a few long-range edges.
    src_list, dst_list = [], []
    for i in range(n - 1):
        src_list += [i, i + 1]
        dst_list += [i + 1, i]
    for i in range(0, n - 5, 5):
        src_list.append(i)
        dst_list.append(i + 5)
    edge_index = np.array([src_list, dst_list], np.int64)    # [2, 85], PyG convention

    params = init_gat_layer_params(kp, in_channels, out_channels, heads)

    out = gat_layer_forward(params, x, edge_index, heads=heads,
                            out_channels=out_channels, tm=16)   # tm=16 -> 3 row tiles
    out = jax.block_until_ready(out)
    assert out.shape == (n, heads * out_channels)

    # Correctness sanity check vs a plain-JAX f32 dense reference.  Tolerance is set
    # for bf16 MXU inputs (h / logits / p / residual all flow through bf16).
    adj_ref = np.zeros((n, n), np.float32)
    adj_ref[edge_index[1], edge_index[0]] = 1.0
    adj_ref[np.arange(n), np.arange(n)] = 1.0
    out_ref = _gat_layer_ref(params, x, jnp.asarray(adj_ref),
                             heads=heads, out_channels=out_channels)
    np.testing.assert_allclose(np.asarray(out), np.asarray(out_ref),
                               rtol=3e-2, atol=3e-2)

    print("KERNEL_OK")
</pallas_src>

<mosaic_0001>
module attributes {stable_mosaic.version = 11 : i64} {
  func.func @_prep_kernel(%arg0: i32, %arg1: memref<16x16xbf16, #tpu.memory_space<vmem>>, %arg2: memref<16x128xbf16, #tpu.memory_space<vmem>>, %arg3: memref<16x128xbf16, #tpu.memory_space<vmem>>) attributes {dimension_semantics = [#tpu.dimension_semantics<parallel>], iteration_bounds = array<i64: 3>, scalar_prefetch = 0 : i64, scratch_operands = 0 : i64, tpu.core_type = #tpu.core_type<tc>, window_params = [{transform_indices = @transform_0, window_bounds = array<i64: 16, 16>}, {pipeline_mode = #tpu.pipeline_mode<synchronous>, transform_indices = @transform_1, window_bounds = array<i64: 16, 128>}, {transform_indices = @transform_2, window_bounds = array<i64: 16, 128>}]} {
    %c0 = arith.constant 0 : index
    %c0_0 = arith.constant 0 : index
    %0 = vector.load %arg1[%c0, %c0_0] : memref<16x16xbf16, #tpu.memory_space<vmem>>, vector<16x16xbf16>
    %c0_1 = arith.constant 0 : index
    %c0_2 = arith.constant 0 : index
    %1 = vector.load %arg2[%c0_1, %c0_2] : memref<16x128xbf16, #tpu.memory_space<vmem>>, vector<16x128xbf16>
    %cst = arith.constant dense<0.000000e+00> : vector<16x128xf32>
    %2 = tpu.matmul %0, %1, %cst {dimension_numbers = #tpu.dot_dimension_numbers<[1], [0], [0], [1], [0, 0, 1, 1], [], []>} : vector<16x16xbf16>, vector<16x128xbf16>, vector<16x128xf32> -> vector<16x128xf32>
    %3 = arith.truncf %2 : vector<16x128xf32> to vector<16x128xbf16>
    %c0_3 = arith.constant 0 : index
    %c0_4 = arith.constant 0 : index
    %4 = vector.load %arg3[%c0_3, %c0_4] : memref<16x128xbf16, #tpu.memory_space<vmem>>, vector<16x128xbf16>
    tpu.vector_store %arg3[%c0_3, %c0_4], %3 {strides = array<i32>} : memref<16x128xbf16, #tpu.memory_space<vmem>>, vector<16x128xbf16>,
    return
  }
  func.func @transform_0(%arg0: i32) -> (i32, i32) {
    %c0_i32 = arith.constant 0 : i32
    %c0_i32_0 = arith.constant 0 : i32
    return %arg0, %c0_i32 : i32, i32
  }
  func.func @transform_1(%arg0: i32) -> (i32, i32) {
    %c0_i32 = arith.constant 0 : i32
    %c0_i32_0 = arith.constant 0 : i32
    %c0_i32_1 = arith.constant 0 : i32
    return %c0_i32, %c0_i32_0 : i32, i32
  }
  func.func @transform_2(%arg0: i32) -> (i32, i32) {
    %c0_i32 = arith.constant 0 : i32
    %c0_i32_0 = arith.constant 0 : i32
    return %arg0, %c0_i32 : i32, i32
  }
}

</mosaic_0001>

<bundles_post_ra>
// kernel: tpu_custom_call.1
= control target key start
LH: loop header
LB: loop body
LE: loop exit
PB: predicated region body
PF: predicated region fallthrough
CT: control target
= control target key end

     0   :  { %7 = vsyncpa [#allocation3], 0  ;;  %s559_s0 = inlined_call_operand.vmem [shape: bf16[48,16], index: 0, kind: input, shape index: {}]   ;;  %s560_s1 = inlined_call_operand.vmem [shape: bf16[16,128], index: 1, kind: input, shape index: {}]   ;;  %s561_s2 = inlined_call_operand.hbm [shape: bf16[48,128], index: 2, kind: output, shape index: {}]  }
   0x1   :  { %9 = vsyncpa [#allocation3 + $0x1], 0  ;;  %s454_s9 = smov 0   ;;  %s456_s10 = smov 0  }
   0x2   :  { %s458_s11 = smov 0   ;;  %s460_s12 = smov 0  }
   0x3 LB: > { %s475_s13 = sadd.s32 4294967295, %s432_s12   ;;  %s292_s14 = sadd.s32 4294967294, %s432_s12   ;;  %s432_s12 = sphi %s460_s12, %s567_s12   ;;  %s428_s11 = sphi %s458_s11, %s566_s11   ;;  %s424_s10 = sphi %s456_s10, %s565_s10   ;;  %s420_s9 = sphi %s454_s9, %s564_s9  }
   0x4   : > { %s479_s15 = sadd.s32 1, %s432_s12   ;;  %s69_s16 = sadd.s32 1, %s428_s11 }
   0x5   : > { %s66_s17 = ssub.s32 %s432_s12, %s479_s15  ;;  %p79_p0 = scmp.ne.s32.totalorder %s428_s11, %s424_s10 }
   0x6   : > { %p67_p1 = scmp.eq.s32.totalorder %s66_s17, 0  ;;  %p80_p2 = scmp.eq.s32.totalorder %s475_s13, 2 }
   0x7   : > { %p85_p3 = scmp.ne.s32.totalorder %s424_s10, %s420_s9  ;;  %p86_p4 = scmp.eq.s32.totalorder %s292_s14, 2 }
   0x8   : > { %s490_s18 = scalar_select %p67_p1, %s428_s11, %s69_s16  }
   0x9   : > { %p492_p5 = por %p80_p2, %p79_p0  ;;  %p496_p6 = por %p86_p4, %p85_p3 }
   0xa   : > { %p295_p7 = scmp.ge.s32.totalorder %s432_s12, 1  ;;  %p116_p8 = scmp.lt.s32.totalorder %s432_s12, 4 }
   0xc   : > { %p117_p9 = pnand %p295_p7, %p116_p8 }
   0xd   : > { %v368_v0 = vld [vmem:[%s560_s1] sm:$0xff] (!%p117_p9)   ;;  %v434_v1 = vmov (!%p117_p9), 0.0   ;;  %s297_s23 = sshll.u32 (!%p117_p9), %s475_s13, 1  ;;  %vm435_vm0 = vmmov (!%p117_p9), 0   ;;  %vm161_vm1 = vcmask (!%p117_p9), 130048   ;;  %s135_s28 = sand.u32 (!%p117_p9), 1, %s424_s10  }
   0xe   : > { %120 = sbr.rel (%p117_p9) target bundleno = 256 (0x100), region = 28  ;;  %319 = vmatprep.subr.bf16.mxu0 (!%p117_p9), %v434_v1  ;;  %321 = vmatprep.mubr.msk.bf16.mxu0 (!%p117_p9), %vm435_vm0, %v434_v1  ;;  %p139_p10 = scmp.lt.s32.totalorder (!%p117_p9), %s297_s23, 5 }
   0xf   : > { %320 = vmatpush3.bf16.msra.mxu0 (!%p117_p9), %v368_v0  ;;  %s296_s29 = sshll.u32 (!%p117_p9), %s135_s28, 3  ;;  %s311_s4 = sshll.u32 (!%p117_p9), %s475_s13, 7 }
  0x10   : > { %s137_s30 = scalar_lea.vmem (!%p117_p9), [#allocation2], %s296_s29  ;;  %s516_s7 = scalar_lea.hbm (!%p117_p9), %s561_s2, %s311_s4 }
  0x11   : > { %s230_s3 = sshll.u32 (!%p117_p9), %s137_s30, 4  ;;  %s518_s8 = scalar_lea.sflag (!%p117_p9), [#allocation3], %s135_s28  ;;  %s511_s3 = int_to_ptr.vmem [resolvable:$true] %s230_s3 }
  0x12   : > { %s370_s14 = scalar_lea.vmem (!%p117_p9), %s511_s3, 128  ;;  %s436_s13 = smov (!%p117_p9), [#allocation2]  }
  0x13   : > { %p371_p11 = scmp.ne.s32.totalorder (!%p117_p9), %s511_s3, %s370_s14  ;;  %s374_s16 = sshll.u32 (!%p117_p9), %s436_s13, 4  ;;  %s375_s16 = int_to_ptr.vmem [resolvable:$false] %s374_s16 }
  0x14   : > { %s376_s17 = scalar_lea.vmem (!%p117_p9), %s375_s16, 256  ;;  %p377_p0 = scmp.lt.s32.totalorder (!%p117_p9), %s511_s3, %s375_s16 }
  0x15   : > { %s569_s23 = smov (!%p139_p10, %s297_s23), 5  ;;  %p372_p12 = pnand %p371_p11, %p492_p5 }
  0x16   : > { %s298_s24 = sshll.u32 %s569_s23, 2  ;;  %p378_p1 = scmp.lt.s32.totalorder %s376_s17, %s370_s14 }
  0x17   : > { %s142_s27 = scalar_lea.vmem %s559_s0, %s298_s24  ;;  %p373_p13 = pneg %p372_p12 }
  0x18   : > { %v369_v2 = vld [vmem:[%s142_s27] sm:$0xff]   ;;  %p379_p2 = por %p378_p1, %p377_p0 }
  0x19   : > { %322 = vmatmul.mubr.msk.bf16.vlgmr.msra.gmra.mrb[0].mxu0 %vm161_vm1, %v369_v2 }
  0x1a   : > { %p380_p3 = pnand %p379_p2, %p373_p13 }
  0xec   : > { %v199_v3 = vpop.f32.mrb[0].mxu0 }
  0xed   : > { %v323_v4 = vpop.f32.mrb[1].mxu0 }
  0xee   : > { %v202_v5 = vpop.f32.mrb[2].mxu0 }
  0xef   : > { %v315_v6 = vpack.c.bf16 %v202_v5, %v199_v3  ;;  %v324_v7 = vpop.f32.mrb[3].mxu0 }
  0xf1   : > { %316 = vst [vmem:[%s137_s30] sm:$0xff] %v315_v6  }
  0xf2   : > { %383 = shalt.err (!%p380_p3)
}
  0xf3   : > { %s384_s21 = scalar_lea.hbm %s516_s7, 128  ;;  %s388_s24 = scalar_lea.hbm %s561_s2, 384 }
  0xf4   : > { %p385_p4 = scmp.ne.s32.totalorder %s516_s7, %s384_s21  ;;  %p389_p9 = scmp.lt.u32.totalorder %s516_s7, %s561_s2 }
  0xf5   : > { %p390_p10 = scmp.lt.u32.totalorder %s388_s24, %s384_s21  ;;  %p392_p12 = scmp.lt.u32.totalorder %s384_s21, %s516_s7 }
  0xf6   : > { %p386_p7 = pnand %p385_p4, %p492_p5 }
  0xf7   : > { %p391_p11 = por %p390_p10, %p389_p9 }
  0xf8   : > { %p387_p8 = pneg %p386_p7 }
  0xf9   : > { %p393_p13 = por %p392_p12, %p391_p11 }
  0xfb   : > { %p394_p0 = pnand %p393_p13, %p387_p8 }
  0xfd   : > { %397 = shalt.err (!%p394_p0)
}
  0xfe   : > { %s437_s27 = smov 64   ;;  %s438_s28 = smov 4  }
  0xff   : > { %325 = dma.vmem_to_hbm [thread:$0]  (%p492_p5), %s511_s3, 128, %s516_s7, %s518_s8, %s437_s27, %s437_s27, %s438_s28  }
 0x100 PF: > { %p331_p1 = scmp.ge.s32.totalorder %s432_s12, 2  ;;  %s245_s29 = sand.u32 1, %s420_s9  }
 0x101   : > { %s246_s30 = scalar_lea.sflag [#allocation3], %s245_s29 }
 0x102   : > { %p328_p2 = pnand %p331_p1, %p496_p6 }
 0x104   : > { %415 = dma.done.wait (!%p328_p2), %s246_s30, 128  }
 0x105   : > { %417 = vsyncadd (!%p328_p2), %s246_s30, 4294967168  ;;  %p12_p3 = scmp.ge.s32.totalorder %s479_s15, 5   ;;  %s564_s9 = smov %s424_s10 }
 0x106   : > { %s565_s10 = smov %s428_s11  ;;  %s566_s11 = smov %s490_s18 }
 0x107   : > { %s567_s12 = smov %s479_s15  ;;  %14 = sbr.rel (!%p12_p3) target bundleno = 3 (0x3), region = 63 }
 0x10e   :  { %251 = vsyncpa [#allocation3], 1 }
 0x10f   :  { %253 = vsyncpa [#allocation3 + $0x1], 1 }

</bundles_post_ra>
